<compile_context>
chip_gen: v7x
topology: tpu7x:2x2x1
jax: 0.10.0
libtpu: 0.0.40
codegen_flags: <defaults>
</compile_context>

<pallas_src>
import math
import numpy as np
import jax
import jax.numpy as jnp
from jax.experimental import pallas as pl
from jax.experimental.pallas import tpu as pltpu

KLEN = 31
NSIG = 4


# ----------------------------------------------------------------------------
# Deterministic parameter init (gkern from the reference, scipy-free via erf).
# ----------------------------------------------------------------------------
def _norm_cdf(v):
    return 0.5 * (1.0 + math.erf(v / math.sqrt(2.0)))


def _kern1d(kernlen=KLEN, nsig=NSIG):
    interval = (2 * nsig + 1.0) / kernlen
    x = np.linspace(-nsig - interval / 2.0, nsig + interval / 2.0, kernlen + 1)
    cdf = np.array([_norm_cdf(v) for v in x], dtype=np.float64)
    return np.diff(cdf)


def gkern(kernlen=KLEN, nsig=NSIG):
    kern1d = _kern1d(kernlen, nsig)
    kernel_raw = np.sqrt(np.outer(kern1d, kern1d))
    return (kernel_raw / kernel_raw.sum()).astype(np.float32)


def separable_g1(kernlen=KLEN, nsig=NSIG):
    # gkern = sqrt(outer(k,k)) / sum == outer(s/S, s/S) with s = sqrt(k), S = sum(s):
    # exactly separable, so the 2-D conv is two 1-D convs with g1.
    s = np.sqrt(_kern1d(kernlen, nsig))
    return s / s.sum()


def _band(n, g1):
    """Band matrix M with M[i, i+off] = g1[off + pad].

    Left-multiplying an (n, W) image by M performs a 'same' 1-D convolution of
    g1 down the rows with zero padding (the clipped band encodes the padding).
    """
    K = g1.shape[0]
    pad = K // 2
    m = np.zeros((n, n), np.float64)
    for k in range(K):
        off = k - pad
        i0 = max(0, -off)
        i1 = min(n, n - off)
        idx = np.arange(i0, i1)
        m[idx, idx + off] = g1[k]
    return m


# ----------------------------------------------------------------------------
# Kernel 1: separable Gaussian conv (2 MXU matmuls) + min-max norm + max(., att)
# Produces the per-batch modulation map m = max(norm(conv(att)), att), shape (H, W).
# ----------------------------------------------------------------------------
def _conv_norm_kernel(att_ref, bh_ref, bw_ref, m_ref):
    att = att_ref[0]                                                    # (H, W) f32
    # soft = BH @ att @ BW  (row conv then column conv, borders pre-clipped)
    t = jnp.dot(bh_ref[...], att, preferred_element_type=jnp.float32)   # (H, W)
    soft = jnp.dot(t, bw_ref[...], preferred_element_type=jnp.float32)  # (H, W)

    # min_max_norm over the (single-channel) spatial map
    mn = jnp.min(soft, keepdims=True)                                   # (1, 1)
    mx = jnp.max(soft, keepdims=True)                                   # (1, 1)
    inv = pl.reciprocal(mx - mn + 1e-8, approx=True)                    # EUP, one value
    soft = (soft - mn) * inv

    m_ref[0] = jnp.maximum(soft, att)


# ----------------------------------------------------------------------------
# Kernel 2: lane-dense broadcast multiply  out = x * m  on flattened (B, C, H*W)
# ----------------------------------------------------------------------------
def _apply_kernel(m_ref, x_ref, out_ref):
    # m_ref: (1, 1, HW) f32 ; x_ref/out_ref: (1, Ct, HW)
    out_ref[...] = (x_ref[...] * m_ref[...]).astype(out_ref.dtype)


def _pick_c_tile(C, HW, budget_bytes=8 << 20):
    """Largest channel tile whose (double-buffered) x+out blocks fit the budget.

    Tile must be C itself or a multiple of 8 dividing C (BlockSpec (8,128) rule).
    """
    if 4 * C * HW * 4 <= budget_bytes:
        return C
    best = None
    ct = 8
    while ct < C:
        if C % ct == 0 and 4 * ct * HW * 4 <= budget_bytes:
            best = ct
        ct += 8
    return best if best is not None else C


def ha_forward(attention, x):
    """attention: (B,1,H,W) f32, x: (B,C,H,W)."""
    B, _, H, W = attention.shape
    _, C, _, _ = x.shape
    HW = H * W

    g1 = separable_g1()
    bh = jnp.asarray(_band(H, g1), jnp.float32)        # (H, H): left-mult  = conv over rows
    bw = jnp.asarray(_band(W, g1).T, jnp.float32)      # (W, W): right-mult = conv over cols

    att2 = attention[:, 0]                             # (B, H, W)

    # ---- stage 1: per-batch conv + normalize + max(soft, att) ----------------
    m = pl.pallas_call(
        _conv_norm_kernel,
        out_shape=jax.ShapeDtypeStruct((B, H, W), jnp.float32),
        grid=(B,),
        in_specs=[
            pl.BlockSpec((1, H, W), lambda b: (b, 0, 0)),
            pl.BlockSpec((H, H), lambda b: (0, 0)),
            pl.BlockSpec((W, W), lambda b: (0, 0)),
        ],
        out_specs=pl.BlockSpec((1, H, W), lambda b: (b, 0, 0)),
        compiler_params=pltpu.CompilerParams(
            dimension_semantics=("parallel",),
            vmem_limit_bytes=32 * 1024 * 1024),
    )(att2, bh, bw)

    # ---- stage 2: lane-dense elementwise multiply on (B, C, H*W) -------------
    ct = _pick_c_tile(C, HW)
    x3 = x.reshape(B, C, HW)
    m3 = m.reshape(B, 1, HW)

    out3 = pl.pallas_call(
        _apply_kernel,
        out_shape=jax.ShapeDtypeStruct((B, C, HW), x.dtype),
        grid=(B, C // ct),
        in_specs=[
            pl.BlockSpec((1, 1, HW), lambda b, c: (b, 0, 0)),
            pl.BlockSpec((1, ct, HW), lambda b, c: (b, c, 0)),
        ],
        out_specs=pl.BlockSpec((1, ct, HW), lambda b, c: (b, c, 0)),
        compiler_params=pltpu.CompilerParams(
            dimension_semantics=("parallel", "parallel"),
            vmem_limit_bytes=32 * 1024 * 1024),
    )(m3, x3)

    return out3.reshape(B, C, H, W)


# ----------------------------------------------------------------------------
# Pure-JAX reference for correctness checking (full 2-D conv, f32).
# ----------------------------------------------------------------------------
def ha_reference(attention, x, gauss):
    g = jnp.asarray(gauss)[None, None]                                  # (1,1,31,31) OIHW
    soft = jax.lax.conv_general_dilated(
        attention, g, window_strides=(1, 1), padding=((15, 15), (15, 15)),
        dimension_numbers=("NCHW", "OIHW", "NCHW"))
    mx = soft.max(axis=(2, 3), keepdims=True)
    mn = soft.min(axis=(2, 3), keepdims=True)
    soft = (soft - mn) / (mx - mn + 1e-8)
    return x * jnp.maximum(soft, attention)


if __name__ == "__main__":
    B, C, H, W = 2, 4, 16, 16
    key = jax.random.PRNGKey(0)
    k1, k2 = jax.random.split(key)
    attention = jax.random.uniform(k1, (B, 1, H, W), dtype=jnp.float32)
    x = jax.random.normal(k2, (B, C, H, W), dtype=jnp.float32)

    out = jax.block_until_ready(ha_forward(attention, x))
    ref = jax.block_until_ready(ha_reference(attention, x, gkern()))

    assert out.shape == (B, C, H, W)
    # 1e-3 tolerance covers the EUP approximate reciprocal in the normalization
    # and the separable (different accumulation order) conv vs. the XLA f32
    # reference; genuine bugs produce errors orders of magnitude larger.
    assert jnp.allclose(out, ref, atol=1e-3, rtol=1e-3), "mismatch vs reference"

    print("KERNEL_OK")
</pallas_src>

<mosaic_0001>
module attributes {stable_mosaic.version = 11 : i64} {
  func.func @_conv_norm_kernel(%arg0: i32, %arg1: memref<1x16x16xf32, #tpu.memory_space<vmem>>, %arg2: memref<16x16xf32, #tpu.memory_space<vmem>>, %arg3: memref<16x16xf32, #tpu.memory_space<vmem>>, %arg4: memref<1x16x16xf32, #tpu.memory_space<vmem>>) attributes {dimension_semantics = [#tpu.dimension_semantics<parallel>], iteration_bounds = array<i64: 2>, scalar_prefetch = 0 : i64, scratch_operands = 0 : i64, tpu.core_type = #tpu.core_type<tc>, window_params = [{transform_indices = @transform_0, window_bounds = array<i64: 1, 16, 16>}, {pipeline_mode = #tpu.pipeline_mode<synchronous>, transform_indices = @transform_1, window_bounds = array<i64: 16, 16>}, {pipeline_mode = #tpu.pipeline_mode<synchronous>, transform_indices = @transform_2, window_bounds = array<i64: 16, 16>}, {transform_indices = @transform_3, window_bounds = array<i64: 1, 16, 16>}]} {
    %c0 = arith.constant 0 : index
    %c0_0 = arith.constant 0 : index
    %c0_1 = arith.constant 0 : index
    %0 = vector.load %arg1[%c0, %c0_0, %c0_1] : memref<1x16x16xf32, #tpu.memory_space<vmem>>, vector<1x16x16xf32>
    %1 = vector.shape_cast %0 : vector<1x16x16xf32> to vector<16x16xf32>
    %c0_2 = arith.constant 0 : index
    %c0_3 = arith.constant 0 : index
    %2 = vector.load %arg2[%c0_2, %c0_3] : memref<16x16xf32, #tpu.memory_space<vmem>>, vector<16x16xf32>
    %cst = arith.constant dense<0.000000e+00> : vector<16x16xf32>
    %3 = tpu.matmul %2, %1, %cst {dimension_numbers = #tpu.dot_dimension_numbers<[1], [0], [0], [1], [0, 0, 1, 1], [], []>} : vector<16x16xf32>, vector<16x16xf32>, vector<16x16xf32> -> vector<16x16xf32>
    %c0_4 = arith.constant 0 : index
    %c0_5 = arith.constant 0 : index
    %4 = vector.load %arg3[%c0_4, %c0_5] : memref<16x16xf32, #tpu.memory_space<vmem>>, vector<16x16xf32>
    %cst_6 = arith.constant dense<0.000000e+00> : vector<16x16xf32>
    %5 = tpu.matmul %3, %4, %cst_6 {dimension_numbers = #tpu.dot_dimension_numbers<[1], [0], [0], [1], [0, 0, 1, 1], [], []>} : vector<16x16xf32>, vector<16x16xf32>, vector<16x16xf32> -> vector<16x16xf32>
    %6 = vector.shape_cast %5 : vector<16x16xf32> to vector<1x16x16xf32>
    %cst_7 = arith.constant dense<0x7F800000> : vector<1xf32>
    %7 = vector.multi_reduction <minimumf>, %6, %cst_7 [1, 2] : vector<1x16x16xf32> to vector<1xf32>
    %8 = vector.shape_cast %7 : vector<1xf32> to vector<1x1x1xf32>
    %9 = vector.extract %8[0, 0, 0] : f32 from vector<1x1x1xf32>
    %10 = vector.broadcast %9 : f32 to vector<1x1xf32>
    %11 = vector.shape_cast %5 : vector<16x16xf32> to vector<1x16x16xf32>
    %cst_8 = arith.constant dense<0xFF800000> : vector<1xf32>
    %12 = vector.multi_reduction <maximumf>, %11, %cst_8 [1, 2] : vector<1x16x16xf32> to vector<1xf32>
    %13 = vector.shape_cast %12 : vector<1xf32> to vector<1x1x1xf32>
    %14 = vector.extract %13[0, 0, 0] : f32 from vector<1x1x1xf32>
    %15 = vector.broadcast %14 : f32 to vector<1x1xf32>
    %16 = arith.subf %15, %10 : vector<1x1xf32>
    %cst_9 = arith.constant 9.99999993E-9 : f32
    %17 = vector.broadcast %cst_9 : f32 to vector<1x1xf32>
    %18 = arith.addf %16, %17 : vector<1x1xf32>
    %19 = tpu.reciprocal %18 {approx = true} : vector<1x1xf32> -> vector<1x1xf32>
    %20 = vector.broadcast %10 : vector<1x1xf32> to vector<16x16xf32>
    %21 = arith.subf %5, %20 : vector<16x16xf32>
    %22 = vector.broadcast %19 : vector<1x1xf32> to vector<16x16xf32>
    %23 = arith.mulf %21, %22 : vector<16x16xf32>
    %24 = arith.maximumf %23, %1 : vector<16x16xf32>
    %c0_10 = arith.constant 0 : index
    %c0_11 = arith.constant 0 : index
    %c0_12 = arith.constant 0 : index
    %25 = vector.load %arg4[%c0_10, %c0_11, %c0_12] : memref<1x16x16xf32, #tpu.memory_space<vmem>>, vector<1x16x16xf32>
    %26 = vector.shape_cast %25 : vector<1x16x16xf32> to vector<16x16xf32>
    %27 = vector.shape_cast %24 : vector<16x16xf32> to vector<1x16x16xf32>
    tpu.vector_store %arg4[%c0_10, %c0_11, %c0_12], %27 {strides = array<i32>} : memref<1x16x16xf32, #tpu.memory_space<vmem>>, vector<1x16x16xf32>,
    return
  }
  func.func @transform_0(%arg0: i32) -> (i32, i32, i32) {
    %c0_i32 = arith.constant 0 : i32
    %c0_i32_0 = arith.constant 0 : i32
    %c0_i32_1 = arith.constant 0 : i32
    return %arg0, %c0_i32, %c0_i32_0 : i32, i32, i32
  }
  func.func @transform_1(%arg0: i32) -> (i32, i32) {
    %c0_i32 = arith.constant 0 : i32
    %c0_i32_0 = arith.constant 0 : i32
    %c0_i32_1 = arith.constant 0 : i32
    return %c0_i32, %c0_i32_0 : i32, i32
  }
  func.func @transform_2(%arg0: i32) -> (i32, i32) {
    %c0_i32 = arith.constant 0 : i32
    %c0_i32_0 = arith.constant 0 : i32
    %c0_i32_1 = arith.constant 0 : i32
    return %c0_i32, %c0_i32_0 : i32, i32
  }
  func.func @transform_3(%arg0: i32) -> (i32, i32, i32) {
    %c0_i32 = arith.constant 0 : i32
    %c0_i32_0 = arith.constant 0 : i32
    %c0_i32_1 = arith.constant 0 : i32
    return %arg0, %c0_i32, %c0_i32_0 : i32, i32, i32
  }
}

</mosaic_0001>

<bundles_post_ra>
// kernel: tpu_custom_call.1
= control target key start
LH: loop header
LB: loop body
LE: loop exit
PB: predicated region body
PF: predicated region fallthrough
CT: control target
= control target key end

     0   :  { %8 = vsyncpa [#allocation3], 0  ;;  %s1112_s0 = inlined_call_operand.hbm [shape: f32[2,16,16], index: 0, kind: input, shape index: {}]   ;;  %s1113_s1 = inlined_call_operand.hbm [shape: f32[16,16], index: 1, kind: input, shape index: {}]   ;;  %s1114_s2 = inlined_call_operand.hbm [shape: f32[16,16], index: 2, kind: input, shape index: {}]   ;;  %s1115_s3 = inlined_call_operand.hbm [shape: f32[2,16,16], index: 3, kind: output, shape index: {}]  }
   0x1   :  { %10 = vsyncpa [#allocation3 + $0x1], 0 }
   0x2   :  { %11 = vsyncpa [#allocation6], 0 }
   0x3   :  { %12 = vsyncpa [#allocation4], 0 }
   0x4   :  { %14 = vsyncpa [#allocation4 + $0x1], 0  ;;  %s847_s12 = smov 0   ;;  %s849_s13 = smov 0  }
   0x5   :  { %s851_s14 = smov 0   ;;  %s853_s15 = smov 0  }
   0x6 LB: > { %s868_s16 = sadd.s32 4294967295, %s817_s15   ;;  %s530_s17 = sadd.s32 4294967294, %s817_s15   ;;  %s817_s15 = sphi %s853_s15, %s1135_s15   ;;  %s813_s14 = sphi %s851_s14, %s1134_s14   ;;  %s809_s13 = sphi %s849_s13, %s1133_s13   ;;  %s805_s12 = sphi %s847_s12, %s1132_s12  }
   0x7   : > { %p40_p0 = scmp.ne.s32.totalorder %s809_s13, %s805_s12  ;;  %p1116_p1 = scmp.eq.s32.totalorder %s868_s16, 0 }
   0x8   : > { %p112_p3 = scmp.eq.s32.totalorder %s530_s17, 1  ;;  %p531_p5 = scmp.ge.s32.totalorder %s817_s15, 1 }
   0x9   : > { %p877_p4 = por %p1116_p1, %p40_p0  ;;  %p119_p7 = scmp.lt.s32.totalorder %s817_s15, 3 }
   0xa   : > { %p882_p6 = por %p112_p3, %p40_p0  ;;  %s819_s21 = smov [#allocation5]  }
   0xb   : > { %s1119_s18 = scalar_select %p877_p4, 1, 0 }
   0xc   : > { %s1120_s19 = scalar_select %p882_p6, 1, 0 }
   0xd   : > { %p887_p8 = pnand %p531_p5, %p119_p7  ;;  %s131_s22 = sshll.u32 %s819_s21, 4  ;;  %s891_s22 = int_to_ptr.vmem [resolvable:$true] %s131_s22 }
   0xe   : > { %s820_s24 = smov [#allocation7]   ;;  %s661_s28 = scalar_lea.hbm %s1113_s1, 256 }
   0xf   : > { %p600_p9 = pneg %p887_p8  ;;  %s144_s25 = sshll.u32 %s820_s24, 4  ;;  %s902_s25 = int_to_ptr.vmem [resolvable:$true] %s144_s25 }
  0x10   : > { %p662_p12 = scmp.ne.s32.totalorder %s1113_s1, %s661_s28  ;;  %p668_p5 = scmp.lt.u32.totalorder %s661_s28, %s1113_s1 }
  0x11   : > { %p898_p11 = pnand %p600_p9, %p1116_p1 }
  0x13   : > { %p663_p13 = pneg %p898_p11 }
  0x15   : > { %p664_p0 = pnand %p663_p13, %p662_p12 }
  0x17   : > { %p665_p3 = pneg %p664_p0 }
  0x19   : > { %p670_p7 = pnand %p668_p5, %p665_p3 }
  0x1b   : > { %673 = shalt.err (!%p670_p7)
}
  0x1c   : > { %s674_s6 = scalar_lea.vmem %s891_s22, 256  ;;  %p682_p2 = scmp.lt.s32.totalorder %s891_s22, %s891_s22 }
  0x1d   : > { %p675_p9 = scmp.ne.s32.totalorder %s891_s22, %s674_s6  ;;  %p683_p12 = scmp.lt.s32.totalorder %s674_s6, %s674_s6 }
  0x1f   : > { %p677_p10 = pnand %p675_p9, %p663_p13  ;;  %p684_p0 = por %p683_p12, %p682_p2 }
  0x21   : > { %p678_p1 = pneg %p677_p10 }
  0x23   : > { %p685_p6 = pnand %p684_p0, %p678_p1 }
  0x25   : > { %688 = shalt.err (!%p685_p6)
}
  0x26   : > { %s821_s7 = smov 128   ;;  %s822_s8 = smov 8  }
  0x27   : > { %603 = dma.hbm_to_vmem [thread:$0]  (!%p898_p11), %s1113_s1, 256, %s891_s22, [#allocation6], %s821_s7, %s821_s7, %s822_s8  }
  0x28   : > { %s689_s21 = scalar_lea.hbm %s1114_s2, 256 }
  0x29   : > { %p690_p1 = scmp.ne.s32.totalorder %s1114_s2, %s689_s21  ;;  %p696_p10 = scmp.lt.u32.totalorder %s689_s21, %s1114_s2 }
  0x2b   : > { %p692_p2 = pnand %p690_p1, %p663_p13 }
  0x2d   : > { %p693_p6 = pneg %p692_p2 }
  0x2f   : > { %p698_p3 = pnand %p696_p10, %p693_p6 }
  0x31   : > { %701 = shalt.err (!%p698_p3)
}
  0x32   : > { %s702_s22 = scalar_lea.vmem %s902_s25, 256  ;;  %p710_p12 = scmp.lt.s32.totalorder %s902_s25, %s902_s25 }
  0x33   : > { %p703_p5 = scmp.ne.s32.totalorder %s902_s25, %s702_s22  ;;  %p711_p0 = scmp.lt.s32.totalorder %s702_s22, %s702_s22 }
  0x35   : > { %p705_p7 = pnand %p703_p5, %p663_p13  ;;  %p712_p1 = por %p711_p0, %p710_p12 }
  0x37   : > { %p706_p9 = pneg %p705_p7 }
  0x39   : > { %p713_p2 = pnand %p712_p1, %p706_p9 }
  0x3b   : > { %716 = shalt.err (!%p713_p2)
}
  0x3c   : > { %606 = dma.hbm_to_vmem [thread:$0]  (!%p898_p11), %s1114_s2, 256, %s902_s25, [#allocation6], %s821_s7, %s821_s7, %s822_s8  }
  0x3d   : > { %s963_s23 = sadd.s32 1, %s817_s15   ;;  %s27_s4 = sadd.s32 1, %s813_s14 }
  0x3e   : > { %s24_s5 = ssub.s32 %s817_s15, %s963_s23  ;;  %p34_p13 = scmp.ne.s32.totalorder %s813_s14, %s809_s13 }
  0x3f   : > { %p25_p6 = scmp.eq.s32.totalorder %s24_s5, 0  ;;  %p35_p10 = scmp.eq.s32.totalorder %s817_s15, 0 }
  0x40   : > { %p1123_p3 = scmp.eq.s32.totalorder %s868_s16, 1  ;;  %p617_p7 = scmp.lt.s32.totalorder %s817_s15, 2 }
  0x41   : > { %s979_s9 = scalar_select %p25_p6, %s813_s14, %s27_s4  }
  0x42   : > { %p973_p5 = por %p1123_p3, %p34_p13  ;;  %p36_p9 = por %p35_p10, %p34_p13 }
  0x43   : > { %s158_s10 = sand.u32 1, %s813_s14   ;;  %s552_s25 = sshll.u32 %s817_s15, 8 }
  0x44   : > { %s1124_s6 = scalar_select %p973_p5, 1, 0 }
  0x45   : > { %s535_s11 = sshll.u32 %s158_s10, 4  ;;  %s986_s24 = scalar_lea.hbm %s1112_s0, %s552_s25 }
  0x46   : > { %s162_s26 = scalar_lea.vmem [#allocation2], %s535_s11  ;;  %p990_p11 = pnand %p617_p7, %p36_p9 }
  0x47   : > { %s169_s27 = sshll.u32 %s162_s26, 4  ;;  %s994_s22 = scalar_lea.sflag [#allocation3], %s158_s10  ;;  %s988_s27 = int_to_ptr.vmem [resolvable:$true] %s169_s27 }
  0x48   : > { %s717_s29 = scalar_lea.hbm %s986_s24, 256  ;;  %p719_p0 = pneg %p990_p11 }
  0x49   : > { %p718_p12 = scmp.ne.s32.totalorder %s986_s24, %s717_s29  ;;  %s722_s5 = scalar_lea.hbm %s1112_s0, 512 }
  0x4a   : > { %p723_p13 = scmp.lt.u32.totalorder %s986_s24, %s1112_s0  ;;  %p724_p6 = scmp.lt.u32.totalorder %s722_s5, %s717_s29 }
  0x4b   : > { %p720_p1 = pnand %p719_p0, %p718_p12  ;;  %p726_p3 = scmp.lt.u32.totalorder %s717_s29, %s986_s24 }
  0x4c   : > { %p725_p10 = por %p724_p6, %p723_p13 }
  0x4d   : > { %p721_p2 = pneg %p720_p1 }
  0x4e   : > { %p727_p7 = por %p726_p3, %p725_p10 }
  0x50   : > { %p728_p9 = pnand %p727_p7, %p721_p2 }
  0x52   : > { %731 = shalt.err (!%p728_p9)
}
  0x53   : > { %s732_s10 = scalar_lea.vmem %s988_s27, 256  ;;  %s823_s17 = smov [#allocation2]  }
  0x54   : > { %p733_p12 = scmp.ne.s32.totalorder %s988_s27, %s732_s10  ;;  %s737_s21 = sshll.u32 %s823_s17, 4  ;;  %s738_s21 = int_to_ptr.vmem [resolvable:$false] %s737_s21 }
  0x55   : > { %s739_s26 = scalar_lea.vmem %s738_s21, 512  ;;  %p740_p4 = scmp.lt.s32.totalorder %s988_s27, %s738_s21 }
  0x56   : > { %p735_p1 = pnand %p733_p12, %p719_p0  ;;  %p741_p13 = scmp.lt.s32.totalorder %s739_s26, %s732_s10 }
  0x58   : > { %p736_p5 = pneg %p735_p1  ;;  %p742_p6 = por %p741_p13, %p740_p4 }
  0x5a   : > { %p743_p10 = pnand %p742_p6, %p736_p5 }
  0x5c   : > { %746 = shalt.err (!%p743_p10)
}
  0x5d   : > { %610 = dma.hbm_to_vmem [thread:$0]  (!%p990_p11), %s986_s24, 256, %s988_s27, %s994_s22, %s821_s7, %s821_s7, %s822_s8  }
  0x5e   : > { %181 = sbr.rel (%p887_p8) target bundleno = 785 (0x311), region = 32  ;;  %s1028_s29 = sand.u32 (!%p887_p8), 1, %s809_s13  }
  0x5f   : > { %s539_s30 = sshll.u32 (!%p887_p8), %s1028_s29, 4  ;;  %s184_s4 = scalar_lea.sflag (!%p887_p8), [#allocation3], %s1028_s29 }
  0x60   : > { %s187_s28 = scalar_lea.vmem (!%p887_p8), [#allocation2], %s539_s30  ;;  %p1126_p4 = scmp.ne.s32.totalorder (!%p887_p8), %s1119_s18, 0 }
  0x65   : > { %792 = dma.done.wait (%p1126_p4), %s184_s4, 256  }
  0x66   : > { %794 = vsyncadd (%p1126_p4), %s184_s4, 4294967040  ;;  %p1127_p5 = scmp.eq.s32.totalorder %s868_s16, 0 }
  0x68   : > { %796 = dma.done.wait (%p1127_p5), [#allocation6], 512   ;;  %p1128_p8 = pmov %p1127_p5 }
  0x69   : > { %vm222_vm0 = vcmask 130048   ;;  %v1042_v0 = vld [vmem:[%s187_s28] sm:$0xff]  ;;  %v1044_v1 = vld [vmem:[%s187_s28 + $0x8] sm:$0xff]  ;;  %s553_s7 = sshll.u32 %s868_s16, 8  ;;  %s217_s8 = scalar_lea.vmem [#allocation8], %s539_s30 }
  0x6a   : > { %798 = vsyncadd (%p1128_p8), [#allocation6], 4294966784  ;;  %v220_v2 = vld [vmem:[#allocation5] sm:$0xff]  ;;  %v576_v3 = vpack.c.bf16 %v1044_v1, %v1042_v0  ;;  %v304_v4 = vld [vmem:[#allocation7] sm:$0xff]  ;;  %s438_s24 = sshll.u32 %s217_s8, 4  ;;  %s1062_s5 = scalar_lea.hbm %s1115_s3, %s553_s7  ;;  %s1064_s24 = int_to_ptr.vmem [resolvable:$true] %s438_s24 }
  0x6b   : > { %566 = vmatprep.mubr.msk.f32.mxu0 %vm222_vm0, %v220_v2  ;;  %v305_v5 = vld [vmem:[#allocation7 + $0x8] sm:$0xff]  ;;  %v221_v7 = vld [vmem:[#allocation5 + $0x8] sm:$0xff]  ;;  %s425_s16 = scalar_lea.sflag [#allocation4], %s1028_s29  ;;  %s747_s11 = scalar_lea.vmem %s1064_s24, 256 }
  0x6c   : > { %v580_v6 = vpack.c.bf16 %v305_v5, %v304_v4  ;;  %577 = vmatprep.subr.bf16.mxu0 %v576_v3  ;;  %p748_p11 = scmp.ne.s32.totalorder %s1064_s24, %s747_s11  ;;  %p1129_p0 = scmp.ne.s32.totalorder %s1124_s6, 0 }
  0x6d   : > { %579 = vmatpush3.bf16.msra.mxu0 %v576_v3  ;;  %s824_s25 = smov [#allocation8]  }
  0x6e   : > { %581 = vmatprep.subr.bf16.mxu1 %v580_v6  ;;  %p749_p2 = pnand %p748_p11, %p1129_p0  ;;  %s751_s10 = sshll.u32 %s824_s25, 4  ;;  %s752_s10 = int_to_ptr.vmem [resolvable:$false] %s751_s10 }
  0x6f   : > { %583 = vmatpush3.bf16.msra.mxu1 %v580_v6  ;;  %s753_s17 = scalar_lea.vmem %s752_s10, 512  ;;  %p754_p7 = scmp.lt.s32.totalorder %s1064_s24, %s752_s10 }
  0x70   : > { %567 = vmatmul.mubr.msk.f32.vlgmr.msra.gmra.mrb[0].mxu0 %vm222_vm0, %v221_v7  ;;  %p750_p3 = pneg %p749_p2  ;;  %p755_p9 = scmp.lt.s32.totalorder %s753_s17, %s747_s11 }
  0x72   : > { %p756_p12 = por %p755_p9, %p754_p7 }
  0x74   : > { %p757_p1 = pnand %p756_p12, %p750_p3 }
 0x143   : > { %v568_v8 = vpop.f32.mrb[0].mxu0 }
 0x144   : > { %v295_v9 = vpop.f32.mrb[1].mxu0 }
 0x145   : > { %573 = vmatprep.mubr.msk.f32.mxu1 %vm222_vm0, %v295_v9 }
 0x146   : > { %574 = vmatmul.mubr.msk.f32.vlgmr.msra.gmra.mrb[0].mxu1 %vm222_vm0, %v568_v8 }
 0x219   : > { %v575_v10 = vpop.f32.mrb[0].mxu1 }
 0x21a   : > { %v378_v11 = vpop.f32.mrb[1].mxu1  ;;  %v388_v12 = vsel %vm222_vm0, %v575_v10, inf  ;;  %v401_v13 = vsel %vm222_vm0, %v575_v10, -inf }
 0x21b   : > { %v400_v14 = vsel %vm222_vm0, %v378_v11, -inf  ;;  %v387_v15 = vsel %vm222_vm0, %v378_v11, inf }
 0x21c   : > { %v389_v16 = vmin.f32 %v387_v15, %v388_v12  ;;  %v402_v17 = vmax.f32 %v400_v14, %v401_v13 }
 0x21e   : > { %390 = vmin.xlane.f32.xlu0 %v389_v16 }
 0x222   : > { %403 = vmax.xlane.f32.xlu0 %v402_v17 }
 0x2ab   : > { %v391_v18 = vpop.xlane.xlu0 %390 }
 0x2ac   : > { %v392_v19 = vrot.slane %v391_v18, 4 }
 0x2ae   : > { %v393_v20 = vmin.f32 %v391_v18, %v392_v19 }
 0x2af   : > { %v404_v21 = vpop.xlane.xlu0 %403 }
 0x2b0   : > { %v394_v22 = vrot.slane %v393_v20, 2  ;;  %v405_v23 = vrot.slane %v404_v21, 4 }
 0x2b2   : > { %v406_v24 = vmax.f32 %v404_v21, %v405_v23  ;;  %v395_v25 = vmin.f32 %v393_v20, %v394_v22 }
 0x2b4   : > { %v407_v26 = vrot.slane %v406_v24, 2  ;;  %v396_v27 = vrot.slane %v395_v25, 1 }
 0x2b6   : > { %v408_v28 = vmax.f32 %v406_v24, %v407_v26  ;;  %v397_v29 = vmin.f32 %v395_v25, %v396_v27 }
 0x2b8   : > { %584 = vpush %v397_v29  ;;  %v409_v30 = vrot.slane %v408_v28, 1 }
 0x2ba   : > { %v410_v31 = vmax.f32 %v408_v28, %v409_v30 }
 0x2bc   : > { %586 = vpush %v410_v31 }
 0x2e9   : > { %s585_s18 = spop %584 }
 0x2ea   : > { %v399_v32 = vstv %s585_s18 }
 0x2eb   : > { %v416_v36 = vsub.f32 %v378_v11, %v399_v32  ;;  %v417_v37 = vsub.f32 %v575_v10, %v399_v32 }
 0x2ed   : > { %s587_s20 = spop %586 }
 0x2ee   : > { %v412_v33 = vstv %s587_s20 }
 0x2ef   : > { %v413_v34 = vsub.f32 %v412_v33, %v399_v32 }
 0x2f1   : > { %v414_v35 = vadd.f32 1e-08, %v413_v34 }
 0x2f3   : > { %659 = vrcp.f32 %v414_v35 }
 0x2fd   : > { %v660_v38 = vpop.eup %659 }
 0x2fe   : > { %v418_v39 = vmul.f32 %v660_v38, %v416_v36  ;;  %v419_v40 = vmul.f32 %v660_v38, %v417_v37 }
 0x300   : > { %v420_v41 = vmax.f32 %v418_v39, %v1042_v0  ;;  %v421_v42 = vmax.f32 %v419_v40, %v1044_v1 }
 0x302   : > { %422 = vst.msk [vmem:[%s217_s8] sm:$0xff] %vm222_vm0, %v420_v41  ;;  %423 = vst.msk [vmem:[%s217_s8 + $0x8] sm:$0xff] %vm222_vm0, %v421_v42 }
 0x303   : > { %760 = shalt.err (!%p757_p1)
}
 0x304   : > { %s761_s21 = scalar_lea.hbm %s1062_s5, 256  ;;  %s765_s4 = scalar_lea.hbm %s1115_s3, 512 }
 0x305   : > { %p762_p13 = scmp.ne.s32.totalorder %s1062_s5, %s761_s21  ;;  %p766_p4 = scmp.lt.u32.totalorder %s1062_s5, %s1115_s3 }
 0x306   : > { %p767_p5 = scmp.lt.u32.totalorder %s765_s4, %s761_s21  ;;  %p769_p11 = scmp.lt.u32.totalorder %s761_s21, %s1062_s5 }
 0x307   : > { %p763_p6 = pnand %p762_p13, %p1129_p0 }
 0x308   : > { %p768_p8 = por %p767_p5, %p766_p4 }
 0x309   : > { %p764_p10 = pneg %p763_p6 }
 0x30a   : > { %p770_p2 = por %p769_p11, %p768_p8 }
 0x30c   : > { %p771_p3 = pnand %p770_p2, %p764_p10 }
 0x30e   : > { %774 = shalt.err (!%p771_p3)
}
 0x30f   : > { %s825_s20 = smov 128   ;;  %s826_s7 = smov 8  }
 0x310   : > { %598 = dma.vmem_to_hbm [thread:$0]  (%p1129_p0), %s1064_s24, 256, %s1062_s5, %s425_s16, %s825_s20, %s825_s20, %s826_s7  }
 0x311 PF: > { %s453_s8 = sand.u32 1, %s805_s12   ;;  %p1130_p7 = scmp.ne.s32.totalorder %s1120_s19, 0 }
 0x312   : > { %p1131_p9 = scmp.ge.s32.totalorder %s817_s15, 2  ;;  %s454_s27 = scalar_lea.sflag [#allocation4], %s453_s8 }
 0x314   : > { %p612_p12 = pnand %p1131_p9, %p1130_p7 }
 0x316   : > { %800 = dma.done.wait (!%p612_p12), %s454_s27, 256  }
 0x317   : > { %802 = vsyncadd (!%p612_p12), %s454_s27, 4294967040  ;;  %p17_p1 = scmp.ge.s32.totalorder %s963_s23, 4   ;;  %s1132_s12 = smov %s809_s13 }
 0x318   : > { %s1133_s13 = smov %s813_s14  ;;  %s1134_s14 = smov %s979_s9 }
 0x319   : > { %s1135_s15 = smov %s963_s23  ;;  %19 = sbr.rel (!%p17_p1) target bundleno = 6 (0x6), region = 85 }
 0x320   :  { %459 = vsyncpa [#allocation3], 1 }
 0x321   :  { %461 = vsyncpa [#allocation3 + $0x1], 1 }
 0x322   :  { %462 = vsyncpa [#allocation6], 1 }
 0x323   :  { %463 = vsyncpa [#allocation4], 1 }
 0x324   :  { %465 = vsyncpa [#allocation4 + $0x1], 1 }

</bundles_post_ra>
